<compile_context>
chip_gen: v7x
topology: tpu7x:2x2x1
jax: 0.10.0
libtpu: 0.0.40
codegen_flags: <defaults>
</compile_context>

<pallas_src>
import functools

import jax
import jax.numpy as jnp
from jax.experimental import pallas as pl
from jax.experimental.pallas import tpu as pltpu

_LANE = 128


def _cdiv(a, b):
    return -(-a // b)


def _mlp_kernel(*refs, n_layers, strip, strips_per_block):
    # refs = (x_ref, w0, b0, w1, b1, ..., w_{L-1}, b_{L-1}, out_ref)
    # Feature-major: x_ref is (in_dim, block_cols); weights are PyTorch layout
    # (dout, din); biases are (dout, 1); out_ref is (out_dim, block_cols).
    x_ref = refs[0]
    out_ref = refs[-1]
    param_refs = refs[1:-1]

    in_dim = x_ref.shape[0]

    # Load all weights/biases once per grid step (~12 KiB total); they are
    # loop-invariant across the strip loop below.
    ws = [param_refs[2 * i][...].astype(jnp.float32) for i in range(n_layers)]
    bs = [param_refs[2 * i + 1][...].astype(jnp.float32) for i in range(n_layers)]

    # Inner strip loop: each strip's activations are at most (32, strip) f32
    # = strip/32 vregs, so the whole layer stack stays register-resident.
    @pl.loop(0, strips_per_block)
    def _(s):
        c0 = pl.multiple_of(s * strip, _LANE)
        xs = x_ref[:, pl.ds(c0, strip)].astype(jnp.float32)      # (in_dim, strip)

        # Layer 0: contraction dim == in_dim (2) -> broadcast FMAs on the VPU
        # (an MXU matmul with K=2 would fill 2/128 of the array and still pay
        # full push/pop latency).
        acc = bs[0]                                              # (d0,1) broadcast
        for k in range(in_dim):
            acc = acc + ws[0][:, k:k + 1] * xs[k:k + 1, :]
        h = jnp.tanh(acc) if n_layers > 1 else acc               # act hidden only

        # Remaining layers on the MXU: h = W @ h + b, f32 accumulation.
        for i in range(1, n_layers):
            h = jnp.dot(ws[i], h, preferred_element_type=jnp.float32) + bs[i]
            if i < n_layers - 1:
                h = jnp.tanh(h)

        out_ref[:, pl.ds(c0, strip)] = h.astype(out_ref.dtype)


def mlp_forward(x, params, *, block_cols=16384, strip=512):
    """Run the MLP forward pass as a single Pallas TPU kernel.

    x:      (N, input_dim) float32
    params: list of (W, b) in PyTorch nn.Linear layout:
            W shape (out_dim, in_dim), b shape (out_dim,)
    returns (N, output_dim), matching Net.forward semantics.
    """
    N, in_dim = x.shape
    n_layers = len(params)
    out_dim = params[-1][0].shape[0]

    # --- strip width: multiple of 128, no wider than (padded) N -------------
    strip = max(_LANE, (strip // _LANE) * _LANE)
    strip = min(strip, _cdiv(N, _LANE) * _LANE)

    # --- grid layout: big blocks of whole strips; pad only to strip multiples
    n_strips = _cdiv(N, strip)
    max_strips_per_block = max(1, block_cols // strip)
    grid_steps = _cdiv(n_strips, max_strips_per_block)
    strips_per_block = _cdiv(n_strips, grid_steps)
    block_cols_eff = strips_per_block * strip
    n_total = grid_steps * block_cols_eff

    # Feature-major: batch maps to lanes (lane-dense activations & stores).
    x_t = x.T                                                    # (in_dim, N)
    n_pad = n_total - N
    if n_pad:
        x_t = jnp.pad(x_t, ((0, 0), (0, n_pad)))                 # zero cols, dropped

    flat = []
    in_specs = [pl.BlockSpec((in_dim, block_cols_eff), lambda i: (0, i))]
    for (w, b) in params:
        dout, din = w.shape
        flat.extend([w, b.reshape(dout, 1)])
        # Constant index maps -> these tiny tensors stay resident in VMEM
        # across the whole grid (no per-step DMA).
        in_specs.append(pl.BlockSpec((dout, din), lambda i: (0, 0)))
        in_specs.append(pl.BlockSpec((dout, 1), lambda i: (0, 0)))

    kernel = functools.partial(
        _mlp_kernel, n_layers=n_layers, strip=strip,
        strips_per_block=strips_per_block)

    out_t = pl.pallas_call(
        kernel,
        out_shape=jax.ShapeDtypeStruct((out_dim, n_total), x.dtype),
        grid_spec=pltpu.PrefetchScalarGridSpec(
            num_scalar_prefetch=0,
            grid=(grid_steps,),
            in_specs=in_specs,
            out_specs=pl.BlockSpec((out_dim, block_cols_eff), lambda i: (0, i)),
        ),
        compiler_params=pltpu.CompilerParams(
            dimension_semantics=("parallel",),
        ),
    )(x_t, *flat)

    return out_t[:, :N].T                                        # (N, out_dim)


def init_params(key, input_dim, hidden_sizes, output_dim):
    """Deterministic init mirroring nn.Linear (W is (out_dim, in_dim))."""
    dims = [input_dim] + list(hidden_sizes) + [output_dim]
    params = []
    for i in range(len(dims) - 1):
        din, dout = dims[i], dims[i + 1]
        key, kw, kb = jax.random.split(key, 3)
        bound = 1.0 / jnp.sqrt(jnp.float32(din))
        w = jax.random.uniform(kw, (dout, din), jnp.float32, -bound, bound)
        b = jax.random.uniform(kb, (dout,), jnp.float32, -bound, bound)
        params.append((w, b))
    return params


def reference_forward(x, params):
    """Pure-JAX reference for correctness checking (PyTorch semantics)."""
    h = x
    for i, (w, b) in enumerate(params):
        h = h @ w.T + b
        if i < len(params) - 1:
            h = jnp.tanh(h)
    return h


if __name__ == "__main__":
    input_dim = 2
    output_dim = 1
    hidden_sizes = (32, 32, 32)   # settings.hidden_sizes

    key = jax.random.PRNGKey(0)
    params = init_params(key, input_dim, hidden_sizes, output_dim)

    # Test 1: small batch -> single grid step, single strip (adaptive sizing).
    key, kx1 = jax.random.split(key)
    x1 = jax.random.normal(kx1, (300, input_dim), dtype=jnp.float32)
    out1 = jax.block_until_ready(mlp_forward(x1, params))
    ref1 = reference_forward(x1, params)
    assert out1.shape == (300, output_dim)
    assert jnp.allclose(out1, ref1, atol=1e-5, rtol=1e-5), "mismatch (test 1)"

    # Test 2: exercises multi-block grid AND the in-kernel strip loop.
    key, kx2 = jax.random.split(key)
    x2 = jax.random.normal(kx2, (1300, input_dim), dtype=jnp.float32)
    out2 = jax.block_until_ready(
        mlp_forward(x2, params, block_cols=512, strip=256))
    ref2 = reference_forward(x2, params)
    assert out2.shape == (1300, output_dim)
    assert jnp.allclose(out2, ref2, atol=1e-5, rtol=1e-5), "mismatch (test 2)"

    print("KERNEL_OK")
</pallas_src>

<mosaic_0001>
module attributes {stable_mosaic.version = 11 : i64} {
  func.func @_mlp_kernel(%arg0: i32, %arg1: memref<2x384xf32, #tpu.memory_space<vmem>>, %arg2: memref<32x2xf32, #tpu.memory_space<vmem>>, %arg3: memref<32x1xf32, #tpu.memory_space<vmem>>, %arg4: memref<32x32xf32, #tpu.memory_space<vmem>>, %arg5: memref<32x1xf32, #tpu.memory_space<vmem>>, %arg6: memref<32x32xf32, #tpu.memory_space<vmem>>, %arg7: memref<32x1xf32, #tpu.memory_space<vmem>>, %arg8: memref<1x32xf32, #tpu.memory_space<vmem>>, %arg9: memref<1x1xf32, #tpu.memory_space<vmem>>, %arg10: memref<1x384xf32, #tpu.memory_space<vmem>>) attributes {dimension_semantics = [#tpu.dimension_semantics<parallel>], iteration_bounds = array<i64: 1>, scalar_prefetch = 0 : i64, scratch_operands = 0 : i64, tpu.core_type = #tpu.core_type<tc>, window_params = [{transform_indices = @transform_0, window_bounds = array<i64: 2, 384>}, {pipeline_mode = #tpu.pipeline_mode<synchronous>, transform_indices = @transform_1, window_bounds = array<i64: 32, 2>}, {pipeline_mode = #tpu.pipeline_mode<synchronous>, transform_indices = @transform_2, window_bounds = array<i64: 32, 1>}, {pipeline_mode = #tpu.pipeline_mode<synchronous>, transform_indices = @transform_3, window_bounds = array<i64: 32, 32>}, {pipeline_mode = #tpu.pipeline_mode<synchronous>, transform_indices = @transform_4, window_bounds = array<i64: 32, 1>}, {pipeline_mode = #tpu.pipeline_mode<synchronous>, transform_indices = @transform_5, window_bounds = array<i64: 32, 32>}, {pipeline_mode = #tpu.pipeline_mode<synchronous>, transform_indices = @transform_6, window_bounds = array<i64: 32, 1>}, {pipeline_mode = #tpu.pipeline_mode<synchronous>, transform_indices = @transform_7, window_bounds = array<i64: 1, 32>}, {pipeline_mode = #tpu.pipeline_mode<synchronous>, transform_indices = @transform_8, window_bounds = array<i64: 1, 1>}, {transform_indices = @transform_9, window_bounds = array<i64: 1, 384>}]} {
    %c0 = arith.constant 0 : index
    %c0_0 = arith.constant 0 : index
    %0 = vector.load %arg2[%c0, %c0_0] : memref<32x2xf32, #tpu.memory_space<vmem>>, vector<32x2xf32>
    %c0_1 = arith.constant 0 : index
    %c0_2 = arith.constant 0 : index
    %1 = vector.load %arg4[%c0_1, %c0_2] : memref<32x32xf32, #tpu.memory_space<vmem>>, vector<32x32xf32>
    %c0_3 = arith.constant 0 : index
    %c0_4 = arith.constant 0 : index
    %2 = vector.load %arg6[%c0_3, %c0_4] : memref<32x32xf32, #tpu.memory_space<vmem>>, vector<32x32xf32>
    %c0_5 = arith.constant 0 : index
    %c0_6 = arith.constant 0 : index
    %3 = vector.load %arg8[%c0_5, %c0_6] : memref<1x32xf32, #tpu.memory_space<vmem>>, vector<1x32xf32>
    %c0_7 = arith.constant 0 : index
    %c0_8 = arith.constant 0 : index
    %4 = vector.load %arg3[%c0_7, %c0_8] : memref<32x1xf32, #tpu.memory_space<vmem>>, vector<32x1xf32>
    %c0_9 = arith.constant 0 : index
    %c0_10 = arith.constant 0 : index
    %5 = vector.load %arg5[%c0_9, %c0_10] : memref<32x1xf32, #tpu.memory_space<vmem>>, vector<32x1xf32>
    %c0_11 = arith.constant 0 : index
    %c0_12 = arith.constant 0 : index
    %6 = vector.load %arg7[%c0_11, %c0_12] : memref<32x1xf32, #tpu.memory_space<vmem>>, vector<32x1xf32>
    %c0_13 = arith.constant 0 : index
    %c0_14 = arith.constant 0 : index
    %7 = vector.load %arg9[%c0_13, %c0_14] : memref<1x1xf32, #tpu.memory_space<vmem>>, vector<1x1xf32>
    %c0_i32 = arith.constant 0 : i32
    %c1_i32 = arith.constant 1 : i32
    %8 = arith.muli %c0_i32, %c1_i32 : i32
    %c0_i32_15 = arith.constant 0 : i32
    %9 = arith.addi %c0_i32_15, %8 : i32
    %c384_i32 = arith.constant 384 : i32
    %10 = arith.muli %9, %c384_i32 : i32
    %11 = tpu.assume_multiple %10, 128 : i32
    %c0_16 = arith.constant 0 : index
    %12 = arith.index_cast %11 : i32 to index
    %13 = vector.load %arg1[%c0_16, %12] : memref<2x384xf32, #tpu.memory_space<vmem>>, vector<2x384xf32>
    %14 = vector.extract_strided_slice %0 {offsets = [0, 0], sizes = [32, 1], strides = [1, 1]} : vector<32x2xf32> to vector<32x1xf32>
    %15 = vector.extract_strided_slice %13 {offsets = [0, 0], sizes = [1, 384], strides = [1, 1]} : vector<2x384xf32> to vector<1x384xf32>
    %16 = vector.broadcast %14 : vector<32x1xf32> to vector<32x384xf32>
    %17 = vector.broadcast %15 : vector<1x384xf32> to vector<32x384xf32>
    %18 = arith.mulf %16, %17 : vector<32x384xf32>
    %19 = vector.broadcast %4 : vector<32x1xf32> to vector<32x384xf32>
    %20 = arith.addf %19, %18 : vector<32x384xf32>
    %21 = vector.extract_strided_slice %0 {offsets = [0, 1], sizes = [32, 1], strides = [1, 1]} : vector<32x2xf32> to vector<32x1xf32>
    %22 = vector.extract_strided_slice %13 {offsets = [1, 0], sizes = [1, 384], strides = [1, 1]} : vector<2x384xf32> to vector<1x384xf32>
    %23 = vector.broadcast %21 : vector<32x1xf32> to vector<32x384xf32>
    %24 = vector.broadcast %22 : vector<1x384xf32> to vector<32x384xf32>
    %25 = arith.mulf %23, %24 : vector<32x384xf32>
    %26 = arith.addf %20, %25 : vector<32x384xf32>
    %27 = math.tanh %26 : vector<32x384xf32>
    %cst = arith.constant dense<0.000000e+00> : vector<32x384xf32>
    %28 = tpu.matmul %1, %27, %cst {dimension_numbers = #tpu.dot_dimension_numbers<[1], [0], [0], [1], [0, 0, 1, 1], [], []>} : vector<32x32xf32>, vector<32x384xf32>, vector<32x384xf32> -> vector<32x384xf32>
    %29 = vector.broadcast %5 : vector<32x1xf32> to vector<32x384xf32>
    %30 = arith.addf %28, %29 : vector<32x384xf32>
    %31 = math.tanh %30 : vector<32x384xf32>
    %cst_17 = arith.constant dense<0.000000e+00> : vector<32x384xf32>
    %32 = tpu.matmul %2, %31, %cst_17 {dimension_numbers = #tpu.dot_dimension_numbers<[1], [0], [0], [1], [0, 0, 1, 1], [], []>} : vector<32x32xf32>, vector<32x384xf32>, vector<32x384xf32> -> vector<32x384xf32>
    %33 = vector.broadcast %6 : vector<32x1xf32> to vector<32x384xf32>
    %34 = arith.addf %32, %33 : vector<32x384xf32>
    %35 = math.tanh %34 : vector<32x384xf32>
    %cst_18 = arith.constant dense<0.000000e+00> : vector<1x384xf32>
    %36 = tpu.matmul %3, %35, %cst_18 {dimension_numbers = #tpu.dot_dimension_numbers<[1], [0], [0], [1], [0, 0, 1, 1], [], []>} : vector<1x32xf32>, vector<32x384xf32>, vector<1x384xf32> -> vector<1x384xf32>
    %37 = vector.broadcast %7 : vector<1x1xf32> to vector<1x384xf32>
    %38 = arith.addf %36, %37 : vector<1x384xf32>
    %c0_19 = arith.constant 0 : index
    %39 = arith.index_cast %11 : i32 to index
    %40 = vector.load %arg10[%c0_19, %39] : memref<1x384xf32, #tpu.memory_space<vmem>>, vector<1x384xf32>
    tpu.vector_store %arg10[%c0_19, %39], %38 {strides = array<i32>} : memref<1x384xf32, #tpu.memory_space<vmem>>, vector<1x384xf32>,
    %c1_i32_20 = arith.constant 1 : i32
    return
  }
  func.func @transform_0(%arg0: i32) -> (i32, i32) {
    %c0_i32 = arith.constant 0 : i32
    %c0_i32_0 = arith.constant 0 : i32
    return %c0_i32, %arg0 : i32, i32
  }
  func.func @transform_1(%arg0: i32) -> (i32, i32) {
    %c0_i32 = arith.constant 0 : i32
    %c0_i32_0 = arith.constant 0 : i32
    %c0_i32_1 = arith.constant 0 : i32
    return %c0_i32, %c0_i32_0 : i32, i32
  }
  func.func @transform_2(%arg0: i32) -> (i32, i32) {
    %c0_i32 = arith.constant 0 : i32
    %c0_i32_0 = arith.constant 0 : i32
    %c0_i32_1 = arith.constant 0 : i32
    return %c0_i32, %c0_i32_0 : i32, i32
  }
  func.func @transform_3(%arg0: i32) -> (i32, i32) {
    %c0_i32 = arith.constant 0 : i32
    %c0_i32_0 = arith.constant 0 : i32
    %c0_i32_1 = arith.constant 0 : i32
    return %c0_i32, %c0_i32_0 : i32, i32
  }
  func.func @transform_4(%arg0: i32) -> (i32, i32) {
    %c0_i32 = arith.constant 0 : i32
    %c0_i32_0 = arith.constant 0 : i32
    %c0_i32_1 = arith.constant 0 : i32
    return %c0_i32, %c0_i32_0 : i32, i32
  }
  func.func @transform_5(%arg0: i32) -> (i32, i32) {
    %c0_i32 = arith.constant 0 : i32
    %c0_i32_0 = arith.constant 0 : i32
    %c0_i32_1 = arith.constant 0 : i32
    return %c0_i32, %c0_i32_0 : i32, i32
  }
  func.func @transform_6(%arg0: i32) -> (i32, i32) {
    %c0_i32 = arith.constant 0 : i32
    %c0_i32_0 = arith.constant 0 : i32
    %c0_i32_1 = arith.constant 0 : i32
    return %c0_i32, %c0_i32_0 : i32, i32
  }
  func.func @transform_7(%arg0: i32) -> (i32, i32) {
    %c0_i32 = arith.constant 0 : i32
    %c0_i32_0 = arith.constant 0 : i32
    %c0_i32_1 = arith.constant 0 : i32
    return %c0_i32, %c0_i32_0 : i32, i32
  }
  func.func @transform_8(%arg0: i32) -> (i32, i32) {
    %c0_i32 = arith.constant 0 : i32
    %c0_i32_0 = arith.constant 0 : i32
    %c0_i32_1 = arith.constant 0 : i32
    return %c0_i32, %c0_i32_0 : i32, i32
  }
  func.func @transform_9(%arg0: i32) -> (i32, i32) {
    %c0_i32 = arith.constant 0 : i32
    %c0_i32_0 = arith.constant 0 : i32
    return %c0_i32, %arg0 : i32, i32
  }
}

</mosaic_0001>

<bundles_post_ra>
// kernel: tpu_custom_call.1
= control target key start
LH: loop header
LB: loop body
LE: loop exit
PB: predicated region body
PF: predicated region fallthrough
CT: control target
= control target key end

     0   :  { %s1308_s0 = inlined_call_operand.vmem [shape: f32[2,384], index: 0, kind: input, shape index: {}]   ;;  %s1309_s1 = inlined_call_operand.vmem [shape: f32[32,2], index: 1, kind: input, shape index: {}]   ;;  %s1310_s2 = inlined_call_operand.vmem [shape: f32[32,1], index: 2, kind: input, shape index: {}]   ;;  %s1311_s3 = inlined_call_operand.vmem [shape: f32[32,32], index: 3, kind: input, shape index: {}]   ;;  %s1312_s4 = inlined_call_operand.vmem [shape: f32[32,1], index: 4, kind: input, shape index: {}]   ;;  %s1313_s5 = inlined_call_operand.vmem [shape: f32[32,32], index: 5, kind: input, shape index: {}]   ;;  %s1314_s6 = inlined_call_operand.vmem [shape: f32[32,1], index: 6, kind: input, shape index: {}]   ;;  %s1315_s7 = inlined_call_operand.vmem [shape: f32[1,32], index: 7, kind: input, shape index: {}]   ;;  %s1316_s8 = inlined_call_operand.<no memory space> [shape: f32[1,1], index: 8, kind: input, shape index: {}]   ;;  %s1317_s9 = inlined_call_operand.hbm [shape: f32[1,384], index: 9, kind: output, shape index: {}]  }
   0x1   :  { %v14_v0 = vstv %s1316_s8 }
   0x2   :  { %15 = vst [vmem:[#allocation2] sm:$0x1] %v14_v0 }
   0x3   :  { %v48_v1 = vld [vmem:[%s1310_s2] sm:$0xff]  ;;  %v1104_v3 = vmov 0   ;;  %v49_v4 = vld [vmem:[%s1310_s2 + $0x8] sm:$0xff] }
   0x4   :  { %v35_v2 = vld [vmem:[%s1309_s1] sm:$0xff]  ;;  %1001 = vset.pattern.permute.xlu1 %v1104_v3  ;;  %1000 = vset.pattern.permute.xlu0 %v1104_v3  ;;  %v36_v5 = vld [vmem:[%s1309_s1 + $0x8] sm:$0xff] }
   0x5   :  { %124 = vperm.xlu1 %1001, %v48_v1   ;;  %64 = vperm.xlu0 %1000, %v35_v2  }
   0x6   :  { %16 = vsyncpa [#allocation4], 0  ;;  %v38_v6 = vld [vmem:[%s1309_s1 + $0x18] sm:$0xff]  ;;  %v1105_v7 = vmov 1   ;;  %v37_v8 = vld [vmem:[%s1309_s1 + $0x10] sm:$0xff]  ;;  %vm253_vm0 = vcmask 261120   ;;  %v83_v22 = vlaneseq }
   0x7   :  { %v50_v9 = vld [vmem:[%s1310_s2 + $0x10] sm:$0xff]  ;;  %v51_v10 = vld [vmem:[%s1310_s2 + $0x18] sm:$0xff]  ;;  %v1191_v11 = vld [vmem:[%s1311_s3] sm:$0xff]  ;;  %v1106_v12 = vmov 0.0   ;;  %vm1108_vm1 = vmmov 0  }
   0x8   :  { %330 = vmatprep.mubr.f32.mxu0 %v1106_v12  ;;  %916 = vmatprep.mubr.msk.f32.mxu1 %vm253_vm0, %v1191_v11  ;;  %v52_v13 = vld [vmem:[%s1312_s4] sm:$0xff]  ;;  %v53_v14 = vld [vmem:[%s1312_s4 + $0x8] sm:$0xff]  ;;  %v54_v15 = vld [vmem:[%s1312_s4 + $0x10] sm:$0xff]  ;;  %v1221_v23 = vshrl.u32 %v83_v22, 7  ;;  %vm852_vm2 = vcmp.lt.s32.totalorder %v83_v22, 384 }
   0x9   :  { %129 = vperm.xlu1 %1001, %v49_v4   ;;  %69 = vperm.xlu0 %1000, %v36_v5   ;;  %v56_v16 = vld [vmem:[%s1314_s6] sm:$0xff]  ;;  %v55_v17 = vld [vmem:[%s1312_s4 + $0x18] sm:$0xff]  ;;  %v58_v18 = vld [vmem:[%s1314_s6 + $0x10] sm:$0xff] }
   0xa   :  { %v57_v19 = vld [vmem:[%s1314_s6 + $0x8] sm:$0xff]  ;;  %v60_v20 = vld [vmem:[#allocation2] sm:$0x1]  ;;  %v59_v21 = vld [vmem:[%s1314_s6 + $0x18] sm:$0xff]  ;;  %v1224_v24 = vsub.s32 0, %v1221_v23  ;;  %v89_v26 = vsub.s32 2, %v1221_v23 }
   0xb   :  { %v61_v25 = vld [vmem:[%s1308_s0] sm:$0x3f]  ;;  %v93_v27 = vsub.s32 4, %v1221_v23  ;;  %v172_v28 = vsub.s32 1, %v1221_v23  ;;  %v176_v29 = vsub.s32 3, %v1221_v23  ;;  %v180_v30 = vsub.s32 5, %v1221_v23 }
   0xc   :  { %v86_v31 = vrot.slane %v61_v25, %v1224_v24  ;;  %v90_v33 = vrot.slane %v61_v25, %v89_v26 }
   0xd   :  { %1002 = vset.pattern.permute.xlu1 %v1105_v7  ;;  %79 = vperm.xlu0 %1000, %v38_v6   ;;  %v94_v35 = vrot.slane %v61_v25, %v93_v27  ;;  %v173_v36 = vrot.slane %v61_v25, %v172_v28  ;;  %v177_v37 = vrot.slane %v61_v25, %v176_v29 }
   0xe   :  { %159 = vperm.xlu1 %1002, %v36_v5   ;;  %v181_v38 = vrot.slane %v61_v25, %v180_v30  ;;  %v101_v39 = vrot.slane %v86_v31, %v1224_v24  ;;  %v105_v40 = vrot.slane %v90_v33, %v1224_v24 }
   0xf   :  { %v109_v43 = vrot.slane %v94_v35, %v1224_v24  ;;  %v188_v46 = vrot.slane %v173_v36, %v172_v28  ;;  %v192_v47 = vrot.slane %v177_v37, %v172_v28 }
  0x10   :  { %v196_v48 = vrot.slane %v181_v38, %v172_v28 }
  0x11   :  { %1004 = vset.pattern.permute.xlu0 %v1105_v7 }
  0x12   :  { %1003 = vset.pattern.permute.xlu1 %v1104_v3  ;;  %155 = vperm.xlu0 %1004, %v35_v2  }
  0x13   :  { %74 = vperm.xlu1 %1003, %v37_v8  }
  0x16   :  { %163 = vperm.xlu0 %1004, %v37_v8  }
  0x17   :  { %134 = vperm.xlu1 %1003, %v50_v9  }
  0x1a   :  { %1007 = vset.pattern.permute.xlu0 %v1104_v3 }
  0x1b   :  { %139 = vperm.xlu1 %1003, %v51_v10   ;;  %240 = vperm.xlu0 %1007, %v53_v14  }
  0x1f   :  { %1005 = vset.pattern.permute.xlu1 %v1105_v7  ;;  %454 = vperm.xlu0 %1007, %v56_v16  }
  0x20   :  { %167 = vperm.xlu1 %1005, %v38_v6  }
  0x23   :  { %464 = vperm.xlu0 %1007, %v58_v18  }
  0x24   :  { %1006 = vset.pattern.permute.xlu1 %v1104_v3 }
  0x25   :  { %235 = vperm.xlu1 %1006, %v52_v13  }
  0x27   :  { %672 = vperm.xlu0 %1007, %v60_v20  }
  0x29   :  { %245 = vperm.xlu1 %1006, %v54_v15  }
  0x2d   :  { %250 = vperm.xlu1 %1006, %v55_v17  }
  0x31   :  { %459 = vperm.xlu1 %1006, %v57_v19  }
  0x35   :  { %469 = vperm.xlu1 %1006, %v59_v21  }
  0x84   :  { %v125_v32 = vpop.permute.xlu1 %124  ;;  %v65_v34 = vpop.permute.xlu0 %64 }
  0x85   :  { %v110_v51 = vmul.f32 %v101_v39, %v65_v34  ;;  %v111_v52 = vmul.f32 %v105_v40, %v65_v34  ;;  %v112_v53 = vmul.f32 %v109_v43, %v65_v34 }
  0x87   :  { %v142_v63 = vadd.f32 %v125_v32, %v110_v51  ;;  %v143_v0 = vadd.f32 %v125_v32, %v111_v52  ;;  %v144_v3 = vadd.f32 %v125_v32, %v112_v53 }
  0x88   :  { %v130_v41 = vpop.permute.xlu1 %129  ;;  %v70_v42 = vpop.permute.xlu0 %69 }
  0x89   :  { %v113_v44 = vmul.f32 %v101_v39, %v70_v42  ;;  %v114_v45 = vmul.f32 %v105_v40, %v70_v42  ;;  %v115_v49 = vmul.f32 %v109_v43, %v70_v42 }
  0x8b   :  { %v145_v54 = vadd.f32 %v130_v41, %v113_v44  ;;  %v146_v56 = vadd.f32 %v130_v41, %v114_v45  ;;  %v147_v60 = vadd.f32 %v130_v41, %v115_v49 }
  0x8c   :  { %v80_v50 = vpop.permute.xlu0 %79 }
  0x8d   :  { %v160_v55 = vpop.permute.xlu1 %159  ;;  %v119_v30 = vmul.f32 %v101_v39, %v80_v50  ;;  %v120_v31 = vmul.f32 %v105_v40, %v80_v50  ;;  %v121_v34 = vmul.f32 %v109_v43, %v80_v50 }
  0x8e   :  { %v200_v57 = vmul.f32 %v188_v46, %v160_v55  ;;  %v201_v58 = vmul.f32 %v192_v47, %v160_v55  ;;  %v202_v59 = vmul.f32 %v196_v48, %v160_v55 }
  0x90   :  { %v212_v61 = vadd.f32 %v200_v57, %v145_v54  ;;  %v213_v62 = vadd.f32 %v201_v58, %v146_v56  ;;  %v214_v1 = vadd.f32 %v202_v59, %v147_v60 }
  0x91   :  { %v156_v2 = vpop.permute.xlu0 %155 }
  0x92   :  { %v197_v4 = vmul.f32 %v188_v46, %v156_v2  ;;  %v198_v5 = vmul.f32 %v192_v47, %v156_v2  ;;  %v199_v6 = vmul.f32 %v196_v48, %v156_v2  ;;  %v75_v7 = vpop.permute.xlu1 %74  ;;  %1008 = vtanh.f32 %v212_v61 }
  0x93   :  { %1010 = vtanh.f32 %v213_v62  ;;  %v116_v13 = vmul.f32 %v101_v39, %v75_v7  ;;  %v117_v16 = vmul.f32 %v105_v40, %v75_v7  ;;  %v118_v19 = vmul.f32 %v109_v43, %v75_v7  ;;  %v40_v62 = vld [vmem:[%s1311_s3 + $0x8] sm:$0xff] }
  0x94   :  { %v209_v8 = vadd.f32 %v197_v4, %v142_v63  ;;  %v210_v9 = vadd.f32 %v198_v5, %v143_v0  ;;  %v211_v10 = vadd.f32 %v199_v6, %v144_v3  ;;  %1012 = vtanh.f32 %v214_v1  ;;  %v41_v63 = vld [vmem:[%s1311_s3 + $0x10] sm:$0xff]  ;;  %v42_v0 = vld [vmem:[%s1311_s3 + $0x18] sm:$0xff] }
  0x95   :  { %v164_v14 = vpop.permute.xlu0 %163 }
  0x96   :  { %1014 = vtanh.f32 %v209_v8  ;;  %v135_v15 = vpop.permute.xlu1 %134  ;;  %v203_v18 = vmul.f32 %v188_v46, %v164_v14  ;;  %v204_v21 = vmul.f32 %v192_v47, %v164_v14  ;;  %v205_v27 = vmul.f32 %v196_v48, %v164_v14 }
  0x97   :  { %1016 = vtanh.f32 %v210_v9  ;;  %v148_v17 = vadd.f32 %v135_v15, %v116_v13  ;;  %v149_v20 = vadd.f32 %v135_v15, %v117_v16  ;;  %v150_v26 = vadd.f32 %v135_v15, %v118_v19 }
  0x98   :  { %1018 = vtanh.f32 %v211_v10 }
  0x99   :  { %v215_v28 = vadd.f32 %v203_v18, %v148_v17  ;;  %v216_v32 = vadd.f32 %v204_v21, %v149_v20  ;;  %v217_v36 = vadd.f32 %v205_v27, %v150_v26 }
  0x9a   :  { %v140_v25 = vpop.permute.xlu1 %139  ;;  %v241_v3 = vpop.permute.xlu0 %240 }
  0x9b   :  { %1020 = vtanh.f32 %v215_v28  ;;  %v151_v37 = vadd.f32 %v140_v25, %v119_v30  ;;  %v152_v38 = vadd.f32 %v140_v25, %v120_v31  ;;  %v153_v44 = vadd.f32 %v140_v25, %v121_v34 }
  0x9c   :  { %v1009_v29 = vpop.eup %1008  ;;  %1022 = vtanh.f32 %v216_v32 }
  0x9d   :  { %v1011_v33 = vpop.eup %1010  ;;  %1024 = vtanh.f32 %v217_v36 }
  0x9e   :  { %v1013_v35 = vpop.eup %1012 }
  0x9f   :  { %v168_v41 = vpop.permute.xlu1 %167 }
  0xa0   :  { %v1015_v42 = vpop.eup %1014  ;;  %v206_v45 = vmul.f32 %v188_v46, %v168_v41  ;;  %v207_v49 = vmul.f32 %v192_v47, %v168_v41  ;;  %v208_v51 = vmul.f32 %v196_v48, %v168_v41 }
  0xa1   :  { %v1017_v52 = vpop.eup %1016  ;;  %v949_v53 = vpack.c.bf16 %v1009_v29, %v1015_v42 }
  0xa2   :  { %v1019_v54 = vpop.eup %1018  ;;  %v218_v39 = vadd.f32 %v206_v45, %v151_v37  ;;  %v219_v40 = vadd.f32 %v207_v49, %v152_v38  ;;  %v220_v55 = vadd.f32 %v208_v51, %v153_v44  ;;  %v947_v56 = vpack.c.bf16 %v1011_v33, %v1017_v52 }
  0xa3   :  { %v955_v43 = vpack.c.bf16 %v1013_v35, %v1019_v54 }
  0xa4   :  { %1026 = vtanh.f32 %v218_v39  ;;  %948 = vmatprep.subr.bf16.mxu0 %v947_v56  ;;  %v236_v1 = vpop.permute.xlu1 %235  ;;  %v44_v39 = vld [vmem:[%s1313_s5 + $0x8] sm:$0xff] }
  0xa5   :  { %1028 = vtanh.f32 %v219_v40  ;;  %956 = vmatprep.subr.bf16.mxu1 %v955_v43  ;;  %950 = vmatpush1.bf16.msra.mxu0 %v949_v53  ;;  %v1021_v46 = vpop.eup %1020 }
  0xa6   :  { %1030 = vtanh.f32 %v220_v55  ;;  %958 = vmatpush3.bf16.msra.mxu1 %v955_v43  ;;  %v1023_v47 = vpop.eup %1022  ;;  %v45_v55 = vld [vmem:[%s1313_s5 + $0x10] sm:$0xff] }
  0xa7   :  { %v1025_v48 = vpop.eup %1024 }
  0xa8   :  { %v246_v2 = vpop.permute.xlu1 %245 }
  0xac   :  { %v251_v14 = vpop.permute.xlu1 %250 }
  0xae   :  { %v1027_v50 = vpop.eup %1026 }
  0xaf   :  { %v1029_v57 = vpop.eup %1028  ;;  %v953_v58 = vpack.c.bf16 %v1027_v50, %v1021_v46 }
  0xb0   :  { %v1031_v59 = vpop.eup %1030  ;;  %v951_v60 = vpack.c.bf16 %v1029_v57, %v1023_v47  ;;  %v46_v47 = vld [vmem:[%s1313_s5 + $0x18] sm:$0xff]  ;;  %v460_v50 = vpop.permute.xlu1 %459 }
  0xb1   :  { %v959_v61 = vpack.c.bf16 %v1031_v59, %v1025_v48  ;;  %v1107_v48 = vmov 0.0|0.0   ;;  %v455_v57 = vpop.permute.xlu0 %454 }
  0xb2   :  { %952 = vmatprep.subr.bf16.mxu0 %v951_v60 }
  0xb3   :  { %960 = vmatprep.subr.bf16.mxu1 %v959_v61  ;;  %954 = vmatpush1.bf16.msra.mxu0 %v953_v58 }
  0xb4   :  { %962 = vmatpush3.bf16.msra.mxu1 %v959_v61 }
  0xb6   :  { %869 = vmatmul.mubr.msk.f32.vlgmr.msra.gmra.mrb[0].mxu0 %vm253_vm0, %v1191_v11  ;;  %v1262_v11 = vld [vmem:[%s1313_s5] sm:$0xff] }
  0xb7   :  { %917 = vmatmul.mubr.msk.f32.vlgmr.msra.gmra.mrb[0].mxu1 %vm253_vm0, %v40_v62  ;;  %336 = vmatprep.mubr.f32.mxu0 %v1106_v12 }
  0xb8   :  { %919 = vmatprep.mubr.msk.f32.mxu1 %vm253_vm0, %v41_v63 }
  0xba   :  { %870 = vmatmul.mubr.msk.f32.gmra.mrb[2].mxu0 %vm253_vm0, %v40_v62  ;;  %v470_v62 = vpop.permute.xlu1 %469 }
  0xbb   :  { %920 = vmatmul.mubr.msk.f32.gmra.mrb[2].mxu1 %vm253_vm0, %v42_v0  ;;  %342 = vmatprep.mubr.f32.mxu0 %v1106_v12 }
  0xbc   :  { %548 = vmatprep.mubr.f32.mxu1 %v1106_v12 }
  0xbe   :  { %871 = vmatmul.mubr.msk.f32.gmra.mrb[4].mxu0 %vm253_vm0, %v41_v63 }
  0xbf   :  { %348 = vmatprep.mubr.f32.mxu0 %v1106_v12 }
  0xc2   :  { %872 = vmatmul.mubr.msk.f32.gmra.mrb[6].mxu0 %vm253_vm0, %v42_v0  ;;  %v465_v0 = vpop.permute.xlu0 %464 }
  0xc3   :  { %930 = vmatprep.mubr.msk.f32.mxu0 %vm253_vm0, %v1262_v11 }
 0x189   :  { %v332_v4 = vpop.f32.mrb[0].mxu0 }
 0x18a   :  { %v333_v5 = vadd.f32 %v332_v4, %v236_v1  ;;  %v918_v6 = vpop.f32.mrb[0].mxu1  ;;  %v334_v7 = vpop.f32.mrb[1].mxu0 }
 0x18b   :  { %v427_v8 = vadd.f32 %v918_v6, %v241_v3  ;;  %v335_v9 = vadd.f32 %v334_v7, %v236_v1  ;;  %v421_v10 = vpop.f32.mrb[1].mxu1 }
 0x18c   :  { %1032 = vtanh.f32 %v333_v5  ;;  %v422_v13 = vadd.f32 %v421_v10, %v236_v1 }
 0x18d   :  { %1034 = vtanh.f32 %v427_v8  ;;  %v338_v15 = vpop.f32.mrb[2].mxu0 }
 0x18e   :  { %1036 = vtanh.f32 %v335_v9  ;;  %v339_v16 = vadd.f32 %v338_v15, %v241_v3  ;;  %v921_v17 = vpop.f32.mrb[2].mxu1  ;;  %v340_v18 = vpop.f32.mrb[3].mxu0 }
 0x18f   :  { %1038 = vtanh.f32 %v422_v13  ;;  %v437_v19 = vadd.f32 %v921_v17, %v251_v14  ;;  %v341_v20 = vadd.f32 %v340_v18, %v241_v3  ;;  %v431_v21 = vpop.f32.mrb[3].mxu1 }
 0x190   :  { %1040 = vtanh.f32 %v339_v16  ;;  %v432_v25 = vadd.f32 %v431_v21, %v246_v2 }
 0x191   :  { %1042 = vtanh.f32 %v437_v19  ;;  %v344_v26 = vpop.f32.mrb[4].mxu0 }
 0x192   :  { %1044 = vtanh.f32 %v341_v20  ;;  %v345_v27 = vadd.f32 %v344_v26, %v246_v2  ;;  %v346_v28 = vpop.f32.mrb[5].mxu0 }
 0x193   :  { %1046 = vtanh.f32 %v432_v25  ;;  %v347_v29 = vadd.f32 %v346_v28, %v246_v2 }
 0x194   :  { %1048 = vtanh.f32 %v345_v27 }
 0x195   :  { %v350_v30 = vpop.f32.mrb[6].mxu0  ;;  %1050 = vtanh.f32 %v347_v29 }
 0x196   :  { %v1033_v31 = vpop.eup %1032  ;;  %v351_v32 = vadd.f32 %v350_v30, %v251_v14  ;;  %v352_v33 = vpop.f32.mrb[7].mxu0  ;;  %v47_v30 = vld [vmem:[%s1315_s7] sm:$0x1]  ;;  %s1110_s7 = smov [#allocation3]  }
 0x197   :  { %v1035_v34 = vpop.eup %1034  ;;  %v353_v35 = vadd.f32 %v352_v33, %v251_v14  ;;  %s861_s10 = sshll.u32 %s1110_s7, 4  ;;  %s862_s10 = int_to_ptr.vmem [resolvable:$true] %s861_s10 }
 0x198   :  { %v1037_v36 = vpop.eup %1036  ;;  %1052 = vtanh.f32 %v351_v32  ;;  %s1080_s11 = scalar_lea.vmem %s862_s10, 48  ;;  %s1084_s12 = scalar_lea.vmem %s862_s10, 64 }
 0x199   :  { %v1039_v37 = vpop.eup %1038  ;;  %1054 = vtanh.f32 %v353_v35  ;;  %p1081_p0 = scmp.ne.s32.totalorder %s862_s10, %s1080_s11  ;;  %p1085_p1 = scmp.lt.s32.totalorder %s862_s10, %s862_s10 }
 0x19a   :  { %v1041_v38 = vpop.eup %1040  ;;  %v971_v41 = vpack.c.bf16 %v1035_v34, %v1039_v37  ;;  %p1086_p2 = scmp.lt.s32.totalorder %s1084_s12, %s1080_s11 }
 0x19b   :  { %v1043_v42 = vpop.eup %1042  ;;  %v965_v44 = vpack.c.bf16 %v1041_v38, %v1033_v31 }
 0x19c   :  { %v1045_v45 = vpop.eup %1044  ;;  %972 = vmatprep.subr.bf16.mxu0 %v971_v41  ;;  %p1087_p3 = por %p1086_p2, %p1085_p1 }
 0x19d   :  { %v1047_v49 = vpop.eup %1046  ;;  %974 = vmatpush3.bf16.msra.mxu0 %v971_v41  ;;  %v963_v51 = vpack.c.bf16 %v1045_v45, %v1037_v36 }
 0x19e   :  { %v975_v52 = vpack.c.bf16 %v1043_v42, %v1047_v49  ;;  %v1049_v53 = vpop.eup %1048  ;;  %p1088_p4 = pnand %p1087_p3, %p1081_p0 }
 0x19f   :  { %964 = vmatprep.subr.bf16.mxu1 %v963_v51  ;;  %v1051_v54 = vpop.eup %1050  ;;  %v1109_v51 = vmov 1966171168  }
 0x1a0   :  { %976 = vmatprep.subr.bf16.mxu0 %v975_v52  ;;  %966 = vmatpush1.bf16.msra.mxu1 %v965_v44 }
 0x1a1   :  { %978 = vmatpush3.bf16.msra.mxu0 %v975_v52  ;;  %v828_v52 = vunpack.c.l.s4 %v1109_v51 }
 0x1a2   :  { %v1053_v40 = vpop.eup %1052 }
 0x1a3   :  { %v1055_v56 = vpop.eup %1054  ;;  %v969_v43 = vpack.c.bf16 %v1053_v40, %v1049_v53  ;;  %v673_v53 = vpop.permute.xlu0 %672 }
 0x1a4   :  { %931 = vmatmul.mubr.msk.f32.vlgmr.msra.gmra.mrb[8].mxu0 %vm253_vm0, %v44_v39  ;;  %v967_v46 = vpack.c.bf16 %v1055_v56, %v1051_v54  ;;  %v829_v54 = vunpack.c.0.s8 %v828_v52 }
 0x1a5   :  { %933 = vmatprep.mubr.msk.f32.mxu0 %vm253_vm0, %v45_v55 }
 0x1a6   :  { %968 = vmatprep.subr.bf16.mxu1 %v967_v46  ;;  %v832_v46 = vsub.s32 %v829_v54, %v1221_v23 }
 0x1a7   :  { %970 = vmatpush1.bf16.msra.mxu1 %v969_v43 }
 0x1a8   :  { %934 = vmatmul.mubr.msk.f32.gmra.mrb[10].mxu0 %vm253_vm0, %v46_v47  ;;  %987 = vmatprep.subr.bf16.mxu1 %v1107_v48 }
 0x1a9   :  { %746 = vmatprep.mubr.f32.mxu0 %v1106_v12 }
 0x1aa   :  { %877 = vmatmul.mubr.msk.f32.vlgmr.msra.gmra.mrb[4].mxu1 %vm253_vm0, %v1262_v11 }
 0x1ab   :  { %554 = vmatprep.mubr.f32.mxu1 %v1106_v12 }
 0x1ae   :  { %878 = vmatmul.mubr.msk.f32.gmra.mrb[6].mxu1 %vm253_vm0, %v44_v39  ;;  %v678_v39 = vrot.slane %v673_v53, %v1224_v24 }
 0x1af   :  { %560 = vmatprep.mubr.f32.mxu1 %v1106_v12 }
 0x1b2   :  { %879 = vmatmul.mubr.msk.f32.gmra.mrb[8].mxu1 %vm253_vm0, %v45_v55 }
 0x1b3   :  { %566 = vmatprep.mubr.f32.mxu1 %v1106_v12 }
 0x1b6   :  { %880 = vmatmul.mubr.msk.f32.gmra.mrb[10].mxu1 %vm253_vm0, %v46_v47 }
 0x1b7   :  { %944 = vmatprep.mubr.msk.f32.mxu1 %vm1108_vm1, %v1106_v12 }
 0x277   :  { %v932_v58 = vpop.f32.mrb[8].mxu0 }
 0x278   :  { %v645_v59 = vadd.f32 %v932_v58, %v460_v50  ;;  %v639_v60 = vpop.f32.mrb[9].mxu0 }
 0x279   :  { %v640_v61 = vadd.f32 %v639_v60, %v455_v57 }
 0x27a   :  { %1056 = vtanh.f32 %v645_v59 }
 0x27b   :  { %1058 = vtanh.f32 %v640_v61  ;;  %v935_v63 = vpop.f32.mrb[10].mxu0 }
 0x27c   :  { %v655_v11 = vadd.f32 %v935_v63, %v470_v62  ;;  %v649_v1 = vpop.f32.mrb[11].mxu0 }
 0x27d   :  { %v650_v2 = vadd.f32 %v649_v1, %v465_v0  ;;  %v550_v3 = vpop.f32.mrb[4].mxu1 }
 0x27e   :  { %1060 = vtanh.f32 %v655_v11  ;;  %v551_v4 = vadd.f32 %v550_v3, %v455_v57  ;;  %v552_v5 = vpop.f32.mrb[5].mxu1 }
 0x27f   :  { %1062 = vtanh.f32 %v650_v2  ;;  %v553_v12 = vadd.f32 %v552_v5, %v455_v57 }
 0x280   :  { %1064 = vtanh.f32 %v551_v4 }
 0x281   :  { %v556_v6 = vpop.f32.mrb[6].mxu1  ;;  %1066 = vtanh.f32 %v553_v12 }
 0x282   :  { %v557_v7 = vadd.f32 %v556_v6, %v460_v50  ;;  %v558_v8 = vpop.f32.mrb[7].mxu1 }
 0x283   :  { %v559_v9 = vadd.f32 %v558_v8, %v460_v50 }
 0x284   :  { %v1057_v10 = vpop.eup %1056  ;;  %1068 = vtanh.f32 %v557_v7 }
 0x285   :  { %v1059_v13 = vpop.eup %1058  ;;  %1070 = vtanh.f32 %v559_v9  ;;  %v562_v14 = vpop.f32.mrb[8].mxu1 }
 0x286   :  { %v563_v15 = vadd.f32 %v562_v14, %v465_v0  ;;  %v564_v16 = vpop.f32.mrb[9].mxu1  ;;  %v988_v17 = vpack.c.bf16 %v1057_v10, %v1059_v13 }
 0x287   :  { %v565_v18 = vadd.f32 %v564_v16, %v465_v0 }
 0x288   :  { %v1061_v19 = vpop.eup %1060  ;;  %989 = vmatpush3.bf16.msra.mxu1 %v988_v17  ;;  %1072 = vtanh.f32 %v563_v15 }
 0x289   :  { %v1063_v20 = vpop.eup %1062  ;;  %v568_v21 = vpop.f32.mrb[10].mxu1  ;;  %990 = vmatprep.subr.bf16.mxu1 %v1107_v48  ;;  %1074 = vtanh.f32 %v565_v18 }
 0x28a   :  { %v569_v25 = vadd.f32 %v568_v21, %v470_v62  ;;  %v570_v26 = vpop.f32.mrb[11].mxu1  ;;  %v991_v27 = vpack.c.bf16 %v1061_v19, %v1063_v20  ;;  %v1065_v29 = vpop.eup %1064 }
 0x28b   :  { %v571_v28 = vadd.f32 %v570_v26, %v470_v62  ;;  %v1067_v31 = vpop.eup %1066 }
 0x28c   :  { %1076 = vtanh.f32 %v569_v25  ;;  %992 = vmatpush3.bf16.msra.mxu1 %v991_v27 }
 0x28d   :  { %1078 = vtanh.f32 %v571_v28 }
 0x28e   :  { %v1069_v32 = vpop.eup %1068 }
 0x28f   :  { %v1071_v33 = vpop.eup %1070  ;;  %945 = vmatmul.mubr.msk.f32.vlgmr.msra.gmra.mrb[12].mxu1 %vm253_vm0, %v47_v30  ;;  %v981_v34 = vpack.c.bf16 %v1069_v32, %v1065_v29 }
 0x290   :  { %v979_v35 = vpack.c.bf16 %v1071_v33, %v1067_v31 }
 0x292   :  { %980 = vmatprep.subr.bf16.mxu0 %v979_v35  ;;  %v1073_v36 = vpop.eup %1072 }
 0x293   :  { %982 = vmatpush1.bf16.msra.mxu0 %v981_v34  ;;  %v1075_v37 = vpop.eup %1074 }
 0x296   :  { %v1077_v38 = vpop.eup %1076 }
 0x297   :  { %v1079_v41 = vpop.eup %1078  ;;  %v985_v42 = vpack.c.bf16 %v1077_v38, %v1073_v36 }
 0x298   :  { %v983_v44 = vpack.c.bf16 %v1079_v41, %v1075_v37 }
 0x29a   :  { %984 = vmatprep.subr.bf16.mxu0 %v983_v44 }
 0x29b   :  { %986 = vmatpush1.bf16.msra.mxu0 %v985_v42 }
 0x29e   :  { %885 = vmatmul.mubr.msk.f32.vlgmr.msra.gmra.mrb[12].mxu0 %vm253_vm0, %v47_v30 }
 0x362   :  { %v819_v45 = vpop.f32.mrb[12].mxu1 }
 0x363   :  { %v946_v49 = vpop.f32.mrb[13].mxu1  ;;  %v820_v43 = vadd.f32 %v819_v45, %v678_v39 }
 0x365   :  { %v840_v50 = vrot.slane %v820_v43, %v832_v46 }
 0x371   :  { %v748_v40 = vpop.f32.mrb[12].mxu0 }
 0x372   :  { %v749_v55 = vadd.f32 %v748_v40, %v678_v39  ;;  %v750_v56 = vpop.f32.mrb[13].mxu0 }
 0x373   :  { %v751_v47 = vadd.f32 %v750_v56, %v678_v39 }
 0x375   :  { %v826_v48 = vcombine.low %v749_v55, %v751_v47 }
 0x377   :  { %v833_v57 = vrot.slane %v826_v48, %v832_v46 }
 0x379   :  { %v841_v58 = vcombine.low %v833_v57, %v840_v50 }
 0x37b   :  { %v848_v59 = vrot.slane %v841_v58, %v832_v46 }
 0x37d   :  { %854 = vst.msk [vmem:[#allocation3] sm:$0x7] %vm852_vm2, %v848_v59 }
 0x37e   :  { %1091 = shalt.err (!%p1088_p4)
}
 0x37f   :  { %s1092_s15 = scalar_lea.hbm %s1317_s9, 48 }
 0x380   :  { %p1093_p5 = scmp.ne.s32.totalorder %s1317_s9, %s1092_s15  ;;  %p1096_p6 = scmp.lt.u32.totalorder %s1092_s15, %s1317_s9 }
 0x382   :  { %p1098_p7 = pnand %p1096_p6, %p1093_p5 }
 0x384   :  { %1101 = shalt.err (!%p1098_p7)
}
 0x385   :  { %864 = dma.vmem_to_hbm [thread:$0]  %s862_s10, 48, %s1317_s9, [#allocation4]  }
 0x386   :  { %1102 = dma.done.wait [#allocation4], 48  }
 0x387   :  { %1103 = vsyncadd [#allocation4], 4294967248 }
 0x388   :  { %868 = vsyncpa [#allocation4], 1 }

</bundles_post_ra>
